<compile_context>
chip_gen: v6e
topology: v6e:2x2x1
jax: 0.10.0
libtpu: 0.0.40
codegen_flags: <defaults>
</compile_context>

<pallas_src>
import functools

import jax
import jax.numpy as jnp
from jax import lax
from jax.experimental import pallas as pl
from jax.experimental.pallas import tpu as pltpu


def _round_up(x, m):
    return (x + m - 1) // m * m


def _vmem_capacity_bytes():
    try:
        return int(pltpu.get_tpu_info().vmem_capacity_bytes)
    except Exception:
        return 128 * 1024 * 1024


_SINGLE_BUFFER_OK = None


def _single_buffer_supported():
    """Probe whether pl.Buffered(1) (single-buffered grid-invariant inputs) lowers and
    runs correctly on this jax/libtpu; fall back to default double-buffering if not."""
    global _SINGLE_BUFFER_OK
    if _SINGLE_BUFFER_OK is None:
        try:
            def k(x_ref, o_ref):
                o_ref[...] = x_ref[...] + 1.0

            out = pl.pallas_call(
                k,
                out_shape=jax.ShapeDtypeStruct((8, 128), jnp.float32),
                grid=(2,),
                in_specs=[pl.BlockSpec((8, 128), lambda i: (0, 0),
                                       pipeline_mode=pl.Buffered(1))],
                out_specs=pl.BlockSpec((8, 128), lambda i: (0, 0)),
            )(jnp.zeros((8, 128), jnp.float32))
            out = jax.block_until_ready(out)
            _SINGLE_BUFFER_OK = bool(jnp.allclose(out, 1.0))
        except Exception:
            _SINGLE_BUFFER_OK = False
    return _SINGLE_BUFFER_OK


def _spec(shape, index_map, *, single_buffer=False):
    if single_buffer and _single_buffer_supported():
        return pl.BlockSpec(shape, index_map, pipeline_mode=pl.Buffered(1))
    return pl.BlockSpec(shape, index_map)


# ----------------------------------------------------------------------------
# Phase 1: hoisted, fused input projection  gi = x @ W_ih_cat + b_i_cat   (bf16 out)
# ----------------------------------------------------------------------------
def _input_proj_kernel(x_ref, w_ref, b_ref, gi_ref):
    x = x_ref[...].astype(jnp.bfloat16)
    gi = jnp.dot(x, w_ref[...], preferred_element_type=jnp.float32) + b_ref[...]
    gi_ref[...] = gi.astype(gi_ref.dtype)


def input_projection(x_ne, w_ih_cat, b_i_cat, *, vmem_cap):
    """x_ne: (N, Ep) f32 (time-major rows); w_ih_cat: (Ep, 3Hp) bf16; b: (1, 3Hp) f32.
    Returns gi: (N, 3Hp) bf16."""
    N, Ep = x_ne.shape
    H3 = w_ih_cat.shape[-1]

    # VMEM-budget-driven row tile (bigger on 128 MiB v5e/v6e, smaller on 64 MiB v7x).
    budget = vmem_cap // 3

    def fp(tm):
        return 2 * (tm * Ep * 4 + tm * H3 * 2) + Ep * H3 * 2 + H3 * 4

    tm = 8
    for cand in (1024, 512, 256, 128, 64, 32, 16, 8):
        if cand <= N and fp(cand) <= budget:
            tm = cand
            break
    while N % tm != 0 and tm > 8:     # N is a multiple of 8, so this terminates
        tm //= 2
    tm = min(tm, N)

    vmem_limit = int(min(100 * 2**20, max(32 * 2**20, 1.5 * fp(tm))))

    return pl.pallas_call(
        _input_proj_kernel,
        out_shape=jax.ShapeDtypeStruct((N, H3), jnp.bfloat16),
        grid_spec=pltpu.PrefetchScalarGridSpec(
            num_scalar_prefetch=0,
            grid=(pl.cdiv(N, tm),),
            in_specs=[
                pl.BlockSpec((tm, Ep), lambda i: (i, 0)),
                _spec(w_ih_cat.shape, lambda i: (0, 0), single_buffer=True),
                _spec(b_i_cat.shape, lambda i: (0, 0), single_buffer=True),
            ],
            out_specs=pl.BlockSpec((tm, H3), lambda i: (i, 0)),
        ),
        compiler_params=pltpu.CompilerParams(
            dimension_semantics=("parallel",),
            vmem_limit_bytes=vmem_limit),
    )(x_ne, w_ih_cat, b_i_cat)


# ----------------------------------------------------------------------------
# Phase 2: chunked recurrence (fused hh matmul) + per-chunk batched Linear head
# ----------------------------------------------------------------------------
def _gru_rec_kernel(gi_ref, h0_ref, whh_ref, bhn_ref, wl_ref, bl_ref,
                    pred_ref, hn_ref, h_scr, h_hist, *, chunk, hp):
    c = pl.program_id(1)

    @pl.when(c == 0)
    def _():
        h_scr[...] = h0_ref[...].astype(jnp.float32)

    # Grid-invariant weights: loaded once per chunk, hoisted out of the step loop.
    whh = whh_ref[...]                       # (Hp, 3Hp) bf16
    bhn = bhn_ref[...]                       # (1, Hp)  f32
    wl = wl_ref[...]                         # (Hp, Wp) bf16
    bl = bl_ref[...]                         # (1, Wp)  f32

    h = h_scr[...]                           # (Bb, Hp) f32 carry

    def step(s, h):
        gi = gi_ref[s].astype(jnp.float32)   # dense (Bb, 3Hp) load (time-major gi)
        # One fused (Bb, Hp) x (Hp, 3Hp) MXU matmul for all three gates; the gate
        # slices below sit on 128-lane boundaries (Hp is a multiple of 128).
        hh = jnp.dot(h.astype(jnp.bfloat16), whh,
                     preferred_element_type=jnp.float32)
        r = jax.nn.sigmoid(gi[:, :hp] + hh[:, :hp])
        z = jax.nn.sigmoid(gi[:, hp:2 * hp] + hh[:, hp:2 * hp])
        n = jnp.tanh(gi[:, 2 * hp:] + r * (hh[:, 2 * hp:] + bhn))
        h = (1.0 - z) * n + z * h
        h_hist[s] = h                        # dense (Bb, Hp) store into VMEM scratch
        return h

    h = lax.fori_loop(0, chunk, step, h, unroll=min(chunk, 8))
    h_scr[...] = h

    @pl.when(c == pl.num_programs(1) - 1)
    def _():
        hn_ref[...] = h.astype(hn_ref.dtype)

    # Batched Linear head: ONE (chunk*Bb, Hp) x (Hp, Wp) matmul and a single dense
    # block store, instead of `chunk` skinny matmuls and masked single-sublane stores.
    bb = h_hist.shape[1]
    hist = h_hist[...].reshape(chunk * bb, hp).astype(jnp.bfloat16)
    p = jnp.dot(hist, wl, preferred_element_type=jnp.float32) + bl
    pred_ref[...] = p.reshape(pred_ref.shape).astype(pred_ref.dtype)


def _pick_chunk(T, bb, Hp, Wp, vmem_cap):
    budget = vmem_cap // 4

    def fp(c):
        return (2 * c * bb * 3 * Hp * 2      # gi blocks (bf16, double-buffered)
                + 2 * c * bb * Wp * 4        # pred blocks (f32, double-buffered)
                + c * bb * Hp * 4)           # h_hist scratch

    for cand in (128, 64, 32, 16, 8):
        if T % cand == 0 and fp(cand) <= budget:
            return cand
    # TODO(synk): pad T (with a masked tail chunk) instead of falling back to chunk=T
    # for long sequences whose length is not a multiple of 8.
    return T


def gru_linear_forward(gi, h0_bh, w_hh_cat, b_hn, w_lin, b_lin, *, chunk, bb, vmem_cap):
    """gi: (T, Bp, 3Hp) bf16 time-major; h0_bh: (Bp, Hp) f32; w_hh_cat: (Hp, 3Hp) bf16;
    b_hn: (1, Hp) f32; w_lin: (Hp, Wp) bf16; b_lin: (1, Wp) f32.
    Returns predict (T, Bp, Wp) f32 (time-major) and hn (Bp, Hp) f32."""
    T, Bp, H3 = gi.shape
    Hp = w_hh_cat.shape[0]
    Wp = w_lin.shape[-1]
    n_chunks = T // chunk
    n_bblocks = Bp // bb

    kernel = functools.partial(_gru_rec_kernel, chunk=chunk, hp=Hp)

    footprint = (2 * chunk * bb * H3 * 2          # gi blocks
                 + 2 * chunk * bb * Wp * 4        # pred blocks
                 + (Hp * H3 + Hp * Wp) * 2        # single-buffered bf16 weights
                 + (Hp + Wp) * 4                  # biases
                 + 2 * bb * Hp * 4                # h0 block
                 + 2 * bb * Hp * 4                # hn block
                 + bb * Hp * 4                    # h_scr
                 + chunk * bb * Hp * 4)           # h_hist
    vmem_limit = int(min(100 * 2**20, max(32 * 2**20, 1.5 * footprint)))

    return pl.pallas_call(
        kernel,
        out_shape=(jax.ShapeDtypeStruct((T, Bp, Wp), jnp.float32),
                   jax.ShapeDtypeStruct((Bp, Hp), jnp.float32)),
        grid_spec=pltpu.PrefetchScalarGridSpec(
            num_scalar_prefetch=0,
            grid=(n_bblocks, n_chunks),
            in_specs=[
                pl.BlockSpec((chunk, bb, H3), lambda b, c: (c, b, 0)),
                pl.BlockSpec((bb, Hp), lambda b, c: (b, 0)),
                _spec((Hp, H3), lambda b, c: (0, 0), single_buffer=True),
                _spec((1, Hp), lambda b, c: (0, 0), single_buffer=True),
                # TODO(synk): if word_size is vocab-scale, tile the head over W (extra
                # parallel grid axis) instead of keeping the full (Hp, Wp) weight and the
                # (chunk, Bb, Wp) pred block VMEM-resident.
                _spec((Hp, Wp), lambda b, c: (0, 0), single_buffer=True),
                _spec((1, Wp), lambda b, c: (0, 0), single_buffer=True),
            ],
            out_specs=(
                pl.BlockSpec((chunk, bb, Wp), lambda b, c: (c, b, 0)),
                pl.BlockSpec((bb, Hp), lambda b, c: (b, 0)),   # resident; written on last chunk
            ),
            scratch_shapes=[pltpu.VMEM((bb, Hp), jnp.float32),
                            pltpu.VMEM((chunk, bb, Hp), jnp.float32)],
        ),
        compiler_params=pltpu.CompilerParams(
            dimension_semantics=("parallel", "arbitrary"),
            vmem_limit_bytes=vmem_limit),
    )(gi, h0_bh, w_hh_cat, b_hn, w_lin, b_lin)


# ----------------------------------------------------------------------------
# GruModel wrapper
# ----------------------------------------------------------------------------
class GruModelPallas:
    def __init__(self, embedded_size, hidden_size, word_size, key):
        self.embedded_size = embedded_size
        self.hidden_size = hidden_size
        self.word_size = word_size
        E, H, W = embedded_size, hidden_size, word_size
        # Lane/MXU-aligned padded dims (pad E/H/W to multiples of 128; padded rows/cols
        # are zero so padded hidden units stay exactly 0 through the recurrence).
        self.Ep = _round_up(E, 128)
        self.Hp = _round_up(H, 128)
        self.Wp = _round_up(W, 128)
        Ep, Hp, Wp = self.Ep, self.Hp, self.Wp

        ks = jax.random.split(key, 6)
        scale = 1.0 / jnp.sqrt(hidden_size)
        # PyTorch GRU params: weight_ih (3H, E), weight_hh (3H, H), biases (3H,)
        w_ih = jax.random.uniform(ks[0], (3 * H, E), jnp.float32, -scale, scale)
        w_hh = jax.random.uniform(ks[1], (3 * H, H), jnp.float32, -scale, scale)
        b_ih = jax.random.uniform(ks[2], (3 * H,), jnp.float32, -scale, scale)
        b_hh = jax.random.uniform(ks[3], (3 * H,), jnp.float32, -scale, scale)
        # Linear: weight (W, H), bias (W,)
        w_lin = jax.random.uniform(ks[4], (W, H), jnp.float32, -scale, scale)
        b_lin = jax.random.uniform(ks[5], (W,), jnp.float32, -scale, scale)
        self.raw = dict(w_ih=w_ih, w_hh=w_hh, b_ih=b_ih, b_hh=b_hh,
                        w_lin=w_lin, b_lin=b_lin)

        def pad2(a, rows, cols):
            return jnp.zeros((rows, cols), jnp.float32).at[:a.shape[0], :a.shape[1]].set(a)

        def pad1(a, cols):
            return jnp.zeros((1, cols), jnp.float32).at[0, :a.shape[0]].set(a)

        # Per-gate (PyTorch order r, z, n), transposed, zero-padded, concatenated along
        # the output axis so the recurrence needs a single (Hp, 3Hp) matmul per step.
        gates_ih = [pad2(w_ih[g * H:(g + 1) * H].T, Ep, Hp) for g in range(3)]
        gates_hh = [pad2(w_hh[g * H:(g + 1) * H].T, Hp, Hp) for g in range(3)]
        self.w_ih_cat = jnp.concatenate(gates_ih, axis=1).astype(jnp.bfloat16)   # (Ep, 3Hp)
        self.w_hh_cat = jnp.concatenate(gates_hh, axis=1).astype(jnp.bfloat16)   # (Hp, 3Hp)
        # b_hh_r / b_hh_z fold into the hoisted input projection; b_hh_n stays in the
        # recurrence (it is multiplied by r).
        b_r = pad1(b_ih[0:H] + b_hh[0:H], Hp)
        b_z = pad1(b_ih[H:2 * H] + b_hh[H:2 * H], Hp)
        b_n = pad1(b_ih[2 * H:3 * H], Hp)
        self.b_i_cat = jnp.concatenate([b_r, b_z, b_n], axis=1)                  # (1, 3Hp) f32
        self.b_hn = pad1(b_hh[2 * H:3 * H], Hp)                                  # (1, Hp)  f32
        self.w_lin_t = pad2(w_lin.T, Hp, Wp).astype(jnp.bfloat16)                # (Hp, Wp)
        self.b_lin = pad1(b_lin, Wp)                                             # (1, Wp)  f32

    def init_h0(self, batch_size):
        return jnp.zeros((1, batch_size, self.hidden_size), jnp.float32)

    def __call__(self, x_embedded, h0):
        # x_embedded: (B, T, E) batch_first; h0: (1, B, H)
        B, T, E = x_embedded.shape
        H, W, Ep, Hp, Wp = self.hidden_size, self.word_size, self.Ep, self.Hp, self.Wp
        vmem_cap = _vmem_capacity_bytes()

        # Pad batch to >= 8 sublanes (padding rows are inert, sliced off at the end).
        Bp = _round_up(max(B, 8), 8)
        # Two batch blocks when the batch allows it so the "parallel" axis can be
        # sharded across v7x's 2 TensorCores; otherwise a single block.
        n_bblocks = 2 if Bp % 16 == 0 else 1
        Bb = Bp // n_bblocks

        x_p = jnp.zeros((Bp, T, Ep), jnp.float32).at[:B, :, :E].set(x_embedded)
        # Time-major layout: every per-step gi load / h store in the recurrence becomes
        # a dense vreg-aligned (Bb, *) access (one small wrapper transpose of x instead
        # of 3*chunk masked sublane loads per chunk).
        x_tm = jnp.transpose(x_p, (1, 0, 2)).reshape(T * Bp, Ep)
        h0_p = jnp.zeros((Bp, Hp), jnp.float32).at[:B, :H].set(h0[0])

        # Phase 1: hoisted fused input projection (bf16 gi halves HBM traffic).
        # TODO(synk): optionally fuse phase 1 into phase 2 (per-chunk x @ W_ih_cat) to
        # avoid materializing gi in HBM at all on bandwidth-limited parts.
        gi = input_projection(x_tm, self.w_ih_cat, self.b_i_cat, vmem_cap=vmem_cap)
        gi = gi.reshape(T, Bp, 3 * Hp)

        # Phase 2: chunked recurrence + per-chunk batched Linear head.
        chunk = _pick_chunk(T, Bb, Hp, Wp, vmem_cap)
        pred_tm, hn_p = gru_linear_forward(
            gi, h0_p, self.w_hh_cat, self.b_hn, self.w_lin_t, self.b_lin,
            chunk=chunk, bb=Bb, vmem_cap=vmem_cap)

        # (T, Bp, Wp) time-major -> flatten(0,1) of the batch-first hidden states.
        predict = jnp.transpose(pred_tm[:, :B, :W], (1, 0, 2)).reshape(B * T, W)
        hn = hn_p[:B, :H][None, :, :]
        return predict, hn
        # TODO(synk): nn.CrossEntropyLoss is declared in the PyTorch __init__ but unused
        # in forward, so it is not implemented here.


# ----------------------------------------------------------------------------
# Pure-JAX reference (PyTorch gate order r, z, n).  Uses the same bf16-quantized
# weights as the kernel (f32 math), so the comparison isolates kernel correctness
# from the intentional bf16 parameter storage.
# ----------------------------------------------------------------------------
def _reference(model, x_embedded, h0):
    q = lambda a: a.astype(jnp.bfloat16).astype(jnp.float32)
    p = model.raw
    H = model.hidden_size
    w_ih, w_hh, b_ih, b_hh = p["w_ih"], p["w_hh"], p["b_ih"], p["b_hh"]
    wir, wiz, win = q(w_ih[0:H].T), q(w_ih[H:2 * H].T), q(w_ih[2 * H:3 * H].T)
    whr, whz, whn = q(w_hh[0:H].T), q(w_hh[H:2 * H].T), q(w_hh[2 * H:3 * H].T)
    wl = q(p["w_lin"].T)

    B, T, E = x_embedded.shape
    h = h0[0].astype(jnp.float32)
    hs = []
    for t in range(T):
        x = x_embedded[:, t, :]
        r = jax.nn.sigmoid(x @ wir + b_ih[0:H] + h @ whr + b_hh[0:H])
        z = jax.nn.sigmoid(x @ wiz + b_ih[H:2 * H] + h @ whz + b_hh[H:2 * H])
        n = jnp.tanh(x @ win + b_ih[2 * H:3 * H] + r * (h @ whn + b_hh[2 * H:3 * H]))
        h = (1.0 - z) * n + z * h
        hs.append(h)
    hidden = jnp.stack(hs, axis=1)                   # (B, T, H) batch_first
    hn = hidden[:, -1, :][None]                      # (1, B, H)
    predict = hidden.reshape(B * T, H) @ wl + p["b_lin"][None, :]
    return predict, hn


if __name__ == "__main__":
    B, T, E, H, W = 2, 8, 16, 32, 64   # batch, seq, embedded, hidden, word_size

    key = jax.random.PRNGKey(0)
    k_param, k_x, k_h = jax.random.split(key, 3)

    model = GruModelPallas(embedded_size=E, hidden_size=H, word_size=W, key=k_param)

    x_embedded = jax.random.normal(k_x, (B, T, E), jnp.float32)
    h0 = jax.random.normal(k_h, (1, B, H), jnp.float32)   # (init_h0 would give zeros)

    predict, hn = model(x_embedded, h0)
    predict = jax.block_until_ready(predict)
    hn = jax.block_until_ready(hn)

    ref_predict, ref_hn = _reference(model, x_embedded, h0)
    assert predict.shape == (B * T, W)
    assert hn.shape == (1, B, H)
    # bf16 gi / in-kernel bf16 matmul operands (f32 accumulation + f32 gate math)
    # -> looser tolerance than a pure-f32 kernel.
    assert jnp.allclose(predict, ref_predict, atol=4e-2, rtol=4e-2), (
        float(jnp.max(jnp.abs(predict - ref_predict))))
    assert jnp.allclose(hn, ref_hn, atol=4e-2, rtol=4e-2), (
        float(jnp.max(jnp.abs(hn - ref_hn))))

    print("KERNEL_OK")
</pallas_src>

<mosaic_0001>
module attributes {stable_mosaic.version = 11 : i64} {
  func.func @k(%arg0: i32, %arg1: memref<8x128xf32, #tpu.memory_space<vmem>>, %arg2: memref<8x128xf32, #tpu.memory_space<vmem>>) attributes {dimension_semantics = [#tpu.dimension_semantics<arbitrary>], iteration_bounds = array<i64: 2>, scalar_prefetch = 0 : i64, scratch_operands = 0 : i64, tpu.core_type = #tpu.core_type<tc>, window_params = [{pipeline_mode = #tpu.pipeline_mode<synchronous>, transform_indices = @transform_0, window_bounds = array<i64: 8, 128>}, {pipeline_mode = #tpu.pipeline_mode<synchronous>, transform_indices = @transform_1, window_bounds = array<i64: 8, 128>}]} {
    %c0 = arith.constant 0 : index
    %c0_0 = arith.constant 0 : index
    %0 = vector.load %arg1[%c0, %c0_0] : memref<8x128xf32, #tpu.memory_space<vmem>>, vector<8x128xf32>
    %cst = arith.constant 1.000000e+00 : f32
    %1 = vector.broadcast %cst : f32 to vector<8x128xf32>
    %2 = arith.addf %0, %1 : vector<8x128xf32>
    %c0_1 = arith.constant 0 : index
    %c0_2 = arith.constant 0 : index
    %3 = vector.load %arg2[%c0_1, %c0_2] : memref<8x128xf32, #tpu.memory_space<vmem>>, vector<8x128xf32>
    tpu.vector_store %arg2[%c0_1, %c0_2], %2 {strides = array<i32>} : memref<8x128xf32, #tpu.memory_space<vmem>>, vector<8x128xf32>,
    return
  }
  func.func @transform_0(%arg0: i32) -> (i32, i32) {
    %c0_i32 = arith.constant 0 : i32
    %c0_i32_0 = arith.constant 0 : i32
    %c0_i32_1 = arith.constant 0 : i32
    return %c0_i32, %c0_i32_0 : i32, i32
  }
  func.func @transform_1(%arg0: i32) -> (i32, i32) {
    %c0_i32 = arith.constant 0 : i32
    %c0_i32_0 = arith.constant 0 : i32
    %c0_i32_1 = arith.constant 0 : i32
    return %c0_i32, %c0_i32_0 : i32, i32
  }
}

module attributes {stable_mosaic.version = 11 : i64} {
  func.func @_input_proj_kernel(%arg0: i32, %arg1: memref<64x128xf32, #tpu.memory_space<vmem>>, %arg2: memref<128x384xbf16, #tpu.memory_space<vmem>>, %arg3: memref<1x384xf32, #tpu.memory_space<vmem>>, %arg4: memref<64x384xbf16, #tpu.memory_space<vmem>>) attributes {dimension_semantics = [#tpu.dimension_semantics<parallel>], iteration_bounds = array<i64: 1>, scalar_prefetch = 0 : i64, scratch_operands = 0 : i64, tpu.core_type = #tpu.core_type<tc>, window_params = [{transform_indices = @transform_0, window_bounds = array<i64: 64, 128>}, {pipeline_mode = #tpu.pipeline_mode<synchronous>, transform_indices = @transform_1, window_bounds = array<i64: 128, 384>}, {pipeline_mode = #tpu.pipeline_mode<synchronous>, transform_indices = @transform_2, window_bounds = array<i64: 1, 384>}, {transform_indices = @transform_3, window_bounds = array<i64: 64, 384>}]} {
    %c0 = arith.constant 0 : index
    %c0_0 = arith.constant 0 : index
    %0 = vector.load %arg1[%c0, %c0_0] : memref<64x128xf32, #tpu.memory_space<vmem>>, vector<64x128xf32>
    %1 = arith.truncf %0 : vector<64x128xf32> to vector<64x128xbf16>
    %c0_1 = arith.constant 0 : index
    %c0_2 = arith.constant 0 : index
    %2 = vector.load %arg2[%c0_1, %c0_2] : memref<128x384xbf16, #tpu.memory_space<vmem>>, vector<128x384xbf16>
    %cst = arith.constant dense<0.000000e+00> : vector<64x384xf32>
    %3 = tpu.matmul %1, %2, %cst {dimension_numbers = #tpu.dot_dimension_numbers<[1], [0], [0], [1], [0, 0, 1, 1], [], []>} : vector<64x128xbf16>, vector<128x384xbf16>, vector<64x384xf32> -> vector<64x384xf32>
    %c0_3 = arith.constant 0 : index
    %c0_4 = arith.constant 0 : index
    %4 = vector.load %arg3[%c0_3, %c0_4] : memref<1x384xf32, #tpu.memory_space<vmem>>, vector<1x384xf32>
    %5 = vector.broadcast %4 : vector<1x384xf32> to vector<64x384xf32>
    %6 = arith.addf %3, %5 : vector<64x384xf32>
    %7 = arith.truncf %6 : vector<64x384xf32> to vector<64x384xbf16>
    %c0_5 = arith.constant 0 : index
    %c0_6 = arith.constant 0 : index
    %8 = vector.load %arg4[%c0_5, %c0_6] : memref<64x384xbf16, #tpu.memory_space<vmem>>, vector<64x384xbf16>
    tpu.vector_store %arg4[%c0_5, %c0_6], %7 {strides = array<i32>} : memref<64x384xbf16, #tpu.memory_space<vmem>>, vector<64x384xbf16>,
    return
  }
  func.func @transform_0(%arg0: i32) -> (i32, i32) {
    %c0_i32 = arith.constant 0 : i32
    %c0_i32_0 = arith.constant 0 : i32
    return %arg0, %c0_i32 : i32, i32
  }
  func.func @transform_1(%arg0: i32) -> (i32, i32) {
    %c0_i32 = arith.constant 0 : i32
    %c0_i32_0 = arith.constant 0 : i32
    %c0_i32_1 = arith.constant 0 : i32
    return %c0_i32, %c0_i32_0 : i32, i32
  }
  func.func @transform_2(%arg0: i32) -> (i32, i32) {
    %c0_i32 = arith.constant 0 : i32
    %c0_i32_0 = arith.constant 0 : i32
    %c0_i32_1 = arith.constant 0 : i32
    return %c0_i32, %c0_i32_0 : i32, i32
  }
  func.func @transform_3(%arg0: i32) -> (i32, i32) {
    %c0_i32 = arith.constant 0 : i32
    %c0_i32_0 = arith.constant 0 : i32
    return %arg0, %c0_i32 : i32, i32
  }
}

</mosaic_0001>

<bundles_post_ra>
// kernel: tpu_custom_call.1
= control target key start
LH: loop header
LB: loop body
LE: loop exit
PB: predicated region body
PF: predicated region fallthrough
CT: control target
= control target key end

     0   :  { %6 = vsyncpa [#allocation3], 0  ;;  %s305_s0 = inlined_call_operand.hbm [shape: f32[8,128], index: 0, kind: input, shape index: {}]   ;;  %s306_s1 = inlined_call_operand.hbm [shape: f32[8,128], index: 1, kind: output, shape index: {}]  }
   0x1   :  { %7 = vsyncpa [#allocation4], 0  ;;  %s258_s6 = smov 0  }
   0x2 LB: > { %s145_s7 = sadd.s32 4294967295, %s244_s6   ;;  %p146_p0 = scmp.ge.s32.totalorder %s244_s6, 1  ;;  %s244_s6 = sphi %s258_s6, %s13_s6  }
   0x3   : > { %p60_p1 = scmp.lt.s32.totalorder %s244_s6, 3  ;;  %p270_p3 = scmp.eq.s32.totalorder %s145_s7, 0 }
   0x4   : > { %s246_s10 = smov [#allocation2]  }
   0x5   : > { %p266_p2 = pnand %p146_p0, %p60_p1  ;;  %s73_s11 = sshll.u32 %s246_s10, 4  ;;  %s74_s11 = int_to_ptr.vmem [resolvable:$true] %s73_s11 }
   0x6   : > { %s191_s12 = scalar_lea.vmem %s74_s11, 128  ;;  %p199_p10 = scmp.lt.s32.totalorder %s74_s11, %s74_s11 }
   0x7   : > { %p162_p4 = pneg %p266_p2  ;;  %p192_p7 = scmp.ne.s32.totalorder %s74_s11, %s191_s12 }
   0x8   : > { %p200_p11 = scmp.lt.s32.totalorder %s191_s12, %s191_s12 }
   0x9   : > { %p163_p5 = pnand %p270_p3, %p162_p4 }
   0xa   : > { %p201_p12 = por %p200_p11, %p199_p10 }
   0xb   : > { %p182_p6 = pneg %p163_p5 }
   0xd   : > { %p194_p8 = pnand %p192_p7, %p182_p6 }
   0xf   : > { %p195_p9 = pneg %p194_p8 }
  0x11   : > { %p202_p13 = pnand %p201_p12, %p195_p9 }
  0x13   : > { %205 = shalt.err (!%p202_p13)
}
  0x14   : > { %165 = dma.hbm_to_vmem [thread:$0]  (!%p163_p5), %s305_s0, 128, %s74_s11, [#allocation3]  }
  0x15   : > { %86 = sbr.rel (%p266_p2) target bundleno = 42 (0x2a), region = 24 }
  0x1a   : > { %235 = dma.done.wait (%p270_p3), [#allocation3], 128  }
  0x1b   : > { %237 = vsyncadd (%p270_p3), [#allocation3], 4294967168  ;;  %s247_s15 = smov [#allocation5]   ;;  %v96_v0 = vld [vmem:[#allocation2] sm:$0xff]  ;;  %p287_p0 = scmp.eq.s32.totalorder %s145_s7, 1 }
  0x1c   : > { %s106_s16 = sshll.u32 %s247_s15, 4  ;;  %v97_v1 = vadd.f32 1.0, %v96_v0  ;;  %s107_s16 = int_to_ptr.vmem [resolvable:$true] %s106_s16 }
  0x1d   : > { %s206_s18 = scalar_lea.vmem %s107_s16, 128  ;;  %p213_p5 = scmp.lt.s32.totalorder %s107_s16, %s107_s16 }
  0x1e   : > { %98 = vst [vmem:[#allocation5] sm:$0xff] %v97_v1  ;;  %p207_p1 = scmp.ne.s32.totalorder %s107_s16, %s206_s18  ;;  %p214_p6 = scmp.lt.s32.totalorder %s206_s18, %s206_s18 }
  0x20   : > { %p208_p2 = pnand %p207_p1, %p287_p0  ;;  %p215_p7 = por %p214_p6, %p213_p5 }
  0x22   : > { %p209_p4 = pneg %p208_p2 }
  0x24   : > { %p216_p3 = pnand %p215_p7, %p209_p4 }
  0x26   : > { %219 = shalt.err (!%p216_p3)
}
  0x27   : > { %159 = dma.vmem_to_hbm [thread:$0]  (%p287_p0), %s107_s16, 128, %s306_s1, [#allocation4]  }
  0x28   : > { %239 = dma.done.wait (%p287_p0), [#allocation4], 128  }
  0x29   : > { %241 = vsyncadd (%p287_p0), [#allocation4], 4294967168 }
  0x2a PF: > { %s13_s6 = sadd.s32 1, %s244_s6  }
  0x2b   : > { %p10_p8 = scmp.ge.s32.totalorder %s13_s6, 4  }
  0x2d   :  { %12 = sbr.rel (!%p10_p8) target bundleno = 2 (0x2), region = 53 }
  0x32   :  { %119 = vsyncpa [#allocation3], 1 }
  0x33   :  { %121 = vsyncpa [#allocation3 + $0x1], 1 }
  0x34   :  { %122 = vsyncpa [#allocation4], 1 }
  0x35   :  { %124 = vsyncpa [#allocation4 + $0x1], 1 }

// kernel: tpu_custom_call.1
= control target key start
LH: loop header
LB: loop body
LE: loop exit
PB: predicated region body
PF: predicated region fallthrough
CT: control target
= control target key end

     0   :  { %8 = vsyncpa [#allocation3], 0  ;;  %s753_s0 = inlined_call_operand.hbm [shape: f32[64,128], index: 0, kind: input, shape index: {}]   ;;  %s754_s1 = inlined_call_operand.hbm [shape: bf16[128,384], index: 1, kind: input, shape index: {}]   ;;  %s755_s2 = inlined_call_operand.vmem [shape: f32[1,384], index: 2, kind: input, shape index: {}]   ;;  %s756_s3 = inlined_call_operand.hbm [shape: bf16[64,384], index: 3, kind: output, shape index: {}]  }
   0x1   :  { %9 = vsyncpa [#allocation6], 0 }
   0x2   :  { %10 = vsyncpa [#allocation4], 0  ;;  %s683_s12 = smov [#allocation2]  }
   0x3   :  { %s16_s13 = sshll.u32 %s683_s12, 4  ;;  %s17_s13 = int_to_ptr.vmem [resolvable:$true] %s16_s13 }
   0x4   :  { %s625_s14 = scalar_lea.vmem %s17_s13, 1024  ;;  %p630_p1 = scmp.lt.s32.totalorder %s17_s13, %s17_s13 }
   0x5   :  { %p626_p0 = scmp.ne.s32.totalorder %s17_s13, %s625_s14  ;;  %p631_p2 = scmp.lt.s32.totalorder %s625_s14, %s625_s14 }
   0x7   :  { %p632_p3 = por %p631_p2, %p630_p1 }
   0x9   :  { %p633_p4 = pnand %p632_p3, %p626_p0 }
   0xb   :  { %636 = shalt.err (!%p633_p4)
}
   0xc   :  { %s684_s15 = smov 128   ;;  %s685_s16 = smov 8  }
   0xd   :  { %22 = dma.hbm_to_vmem [thread:$0]  %s753_s0, 1024, %s17_s13, [#allocation3], %s684_s15, %s684_s15, %s685_s16  }
   0xe   :  { %s686_s19 = smov [#allocation5]  }
   0xf   :  { %s28_s20 = sshll.u32 %s686_s19, 4  ;;  %s29_s20 = int_to_ptr.vmem [resolvable:$true] %s28_s20 }
  0x10   :  { %s645_s21 = scalar_lea.vmem %s29_s20, 3072  ;;  %p650_p6 = scmp.lt.s32.totalorder %s29_s20, %s29_s20 }
  0x11   :  { %p646_p5 = scmp.ne.s32.totalorder %s29_s20, %s645_s21  ;;  %p651_p7 = scmp.lt.s32.totalorder %s645_s21, %s645_s21 }
  0x13   :  { %p652_p8 = por %p651_p7, %p650_p6 }
  0x15   :  { %p653_p9 = pnand %p652_p8, %p646_p5 }
  0x17   :  { %656 = shalt.err (!%p653_p9)
}
  0x18   :  { %s687_s22 = smov 192   ;;  %s688_s23 = smov 12  }
  0x19   :  { %34 = dma.hbm_to_vmem [thread:$0]  %s754_s1, 3072, %s29_s20, [#allocation6], %s687_s22, %s687_s22, %s688_s23  }
  0x1a   :  { %677 = dma.done.wait [#allocation3], 1024  }
  0x1b   :  { %678 = vsyncadd [#allocation3], 4294966272 }
  0x1c   :  { %679 = dma.done.wait [#allocation6], 3072  }
  0x1d   :  { %680 = vsyncadd [#allocation6], 4294964224  ;;  %v689_v0 = vmov 0   ;;  %v585_v1 = vld [vmem:[#allocation5 + $0xac] ss:$12 sps:$4 sm:$0xff]   ;;  %v44_v17 = vld [vmem:[#allocation2] sm:$0xff]  ;;  %v90_v37 = vlaneseq }
  0x1e   :  { %265 = vmatprep.mubr.bf16.mxu0 %v689_v0  ;;  %v587_v2 = vld [vmem:[#allocation5 + $0xa8] ss:$12 sps:$4 sm:$0xff]   ;;  %233 = vmatprep.subr.bf16.mxu0 %v585_v1  ;;  %v590_v4 = vld [vmem:[#allocation5 + $0x90] ss:$12 sps:$4 sm:$0xff]   ;;  %v593_v7 = vld [vmem:[#allocation5 + $0x78] ss:$12 sps:$4 sm:$0xff]  }
  0x1f   :  { %v588_v3 = vld [vmem:[#allocation5 + $0x94] ss:$12 sps:$4 sm:$0xff]   ;;  %234 = vmatpush1.bf16.msra.mxu0 %v587_v2  ;;  %v591_v5 = vld [vmem:[#allocation5 + $0x7c] ss:$12 sps:$4 sm:$0xff]   ;;  %v598_v8 = vld [vmem:[#allocation5 + $0x98] ss:$12 sps:$4 sm:$0xff]  }
  0x20   :  { %235 = vmatprep.subr.bf16.mxu0 %v588_v3  ;;  %v594_v6 = vld [vmem:[#allocation5 + $0xb0] ss:$12 sps:$4 sm:$0xff]   ;;  %v602_v10 = vld [vmem:[#allocation5 + $0x80] ss:$12 sps:$4 sm:$0xff]   ;;  %v606_v13 = vld [vmem:[#allocation5 + $0x68] ss:$12 sps:$4 sm:$0xff]  }
  0x21   :  { %553 = vmatprep.subr.bf16.mxu1 %v594_v6  ;;  %v595_v9 = vld [vmem:[#allocation5 + $0x64] ss:$12 sps:$4 sm:$0xff]   ;;  %v597_v11 = vld [vmem:[#allocation5 + $0x60] ss:$12 sps:$4 sm:$0xff]   ;;  %v601_v14 = vld [vmem:[#allocation5 + $0x48] ss:$12 sps:$4 sm:$0xff]  }
  0x22   :  { %554 = vmatpush3.bf16.msra.mxu1 %v594_v6  ;;  %v599_v12 = vld [vmem:[#allocation5 + $0x4c] ss:$12 sps:$4 sm:$0xff]   ;;  %v603_v15 = vld [vmem:[#allocation5 + $0x34] ss:$12 sps:$4 sm:$0xff]   ;;  %v610_v16 = vld [vmem:[#allocation5 + $0x50] ss:$12 sps:$4 sm:$0xff]  }
  0x23   :  { %236 = vmatpush1.bf16.msra.mxu0 %v590_v4  ;;  %555 = vmatprep.subr.bf16.mxu1 %v598_v8  ;;  %v45_v18 = vld [vmem:[#allocation2 + $0x8] sm:$0xff]  ;;  %v605_v19 = vld [vmem:[#allocation5 + $0x30] ss:$12 sps:$4 sm:$0xff]   ;;  %v614_v22 = vld [vmem:[#allocation5 + $0x38] ss:$12 sps:$4 sm:$0xff]   ;;  %v91_v38 = vshrl.u32 %v90_v37, 7 }
  0x24   :  { %237 = vmatprep.subr.bf16.mxu0 %v591_v5  ;;  %v52_v20 = vpack.c.bf16 %v45_v18, %v44_v17  ;;  %v607_v21 = vld [vmem:[#allocation5 + $0x1c] ss:$12 sps:$4 sm:$0xff]   ;;  %v609_v23 = vld [vmem:[#allocation5 + $0x18] ss:$12 sps:$4 sm:$0xff]   ;;  %v615_v25 = vld [vmem:[#allocation5 + $0x20] ss:$12 sps:$4 sm:$0xff]  }
  0x25   :  { %v611_v24 = vld [vmem:[#allocation5 + $0x4] ss:$12 sps:$4 sm:$0xff]   ;;  %v613_v26 = vld [vmem:[#allocation5] ss:$12 sps:$4 sm:$0xff]   ;;  %v616_v27 = vld [vmem:[#allocation5 + $0x8] ss:$12 sps:$4 sm:$0xff]  }
  0x26   :  { %556 = vmatpush3.bf16.msra.mxu1 %v598_v8  ;;  %569 = vmatprep.mubr.bf16.mxu1 %v52_v20  ;;  %v48_v28 = vld [vmem:[#allocation2 + $0x20] sm:$0xff]  ;;  %v49_v29 = vld [vmem:[#allocation2 + $0x28] sm:$0xff]  ;;  %v46_v30 = vld [vmem:[#allocation2 + $0x10] sm:$0xff]  ;;  %v92_v39 = vsub.s32 0, %v91_v38  ;;  %v96_v40 = vsub.s32 1, %v91_v38  ;;  %v100_v42 = vsub.s32 2, %v91_v38 }
  0x27   :  { %238 = vmatpush1.bf16.msra.mxu0 %v593_v7  ;;  %557 = vmatprep.subr.bf16.mxu1 %v602_v10  ;;  %v47_v31 = vld [vmem:[#allocation2 + $0x18] sm:$0xff]  ;;  %v54_v32 = vpack.c.bf16 %v49_v29, %v48_v28  ;;  %v50_v34 = vld [vmem:[#allocation2 + $0x30] sm:$0xff]  ;;  %v88_v41 = vld [vmem:[%s755_s2] sm:$0x7]  ;;  %s690_s2 = smov [#allocation7]  }
  0x28   :  { %239 = vmatprep.subr.bf16.mxu0 %v595_v9  ;;  %v53_v33 = vpack.c.bf16 %v47_v31, %v46_v30  ;;  %v51_v35 = vld [vmem:[#allocation2 + $0x38] sm:$0xff]  ;;  %v727_v43 = vrot.slane %v88_v41, %v92_v39  ;;  %v729_v44 = vrot.slane %v88_v41, %v96_v40  ;;  %v101_v46 = vrot.slane %v88_v41, %v100_v42  ;;  %s472_s26 = sshll.u32 %s690_s2, 4  ;;  %s473_s26 = int_to_ptr.vmem [resolvable:$true] %s472_s26 }
  0x29   :  { %v55_v36 = vpack.c.bf16 %v51_v35, %v50_v34  ;;  %s657_s27 = scalar_lea.vmem %s473_s26, 1536  ;;  %p662_p11 = scmp.lt.s32.totalorder %s473_s26, %s473_s26 }
  0x2a   :  { %558 = vmatpush3.bf16.msra.mxu1 %v602_v10  ;;  %p658_p10 = scmp.ne.s32.totalorder %s473_s26, %s657_s27  ;;  %p663_p12 = scmp.lt.s32.totalorder %s657_s27, %s657_s27 }
  0x2b   :  { %240 = vmatpush1.bf16.msra.mxu0 %v597_v11  ;;  %559 = vmatprep.subr.bf16.mxu1 %v606_v13 }
  0x2c   :  { %241 = vmatprep.subr.bf16.mxu0 %v599_v12  ;;  %p664_p13 = por %p663_p12, %p662_p11 }
  0x2e   :  { %560 = vmatpush3.bf16.msra.mxu1 %v606_v13  ;;  %p665_p0 = pnand %p664_p13, %p658_p10 }
  0x2f   :  { %242 = vmatpush1.bf16.msra.mxu0 %v601_v14  ;;  %561 = vmatprep.subr.bf16.mxu1 %v610_v16 }
  0x30   :  { %243 = vmatprep.subr.bf16.mxu0 %v603_v15 }
  0x32   :  { %562 = vmatpush3.bf16.msra.mxu1 %v610_v16 }
  0x33   :  { %244 = vmatpush1.bf16.msra.mxu0 %v605_v19  ;;  %563 = vmatprep.subr.bf16.mxu1 %v614_v22 }
  0x34   :  { %245 = vmatprep.subr.bf16.mxu0 %v607_v21 }
  0x36   :  { %564 = vmatpush3.bf16.msra.mxu1 %v614_v22 }
  0x37   :  { %246 = vmatpush1.bf16.msra.mxu0 %v609_v23  ;;  %565 = vmatprep.subr.bf16.mxu1 %v615_v25 }
  0x38   :  { %247 = vmatprep.subr.bf16.mxu0 %v611_v24 }
  0x3a   :  { %566 = vmatpush3.bf16.msra.mxu1 %v615_v25 }
  0x3b   :  { %248 = vmatpush1.bf16.msra.mxu0 %v613_v26  ;;  %567 = vmatprep.subr.bf16.mxu1 %v616_v27 }
  0x3e   :  { %266 = vmatmul.mubr.bf16.vlgmr.msra.gmra.mxu0 %v52_v20  ;;  %568 = vmatpush3.bf16.msra.mxu1 %v616_v27 }
  0x3f   :  { %275 = vmatprep.mubr.bf16.mxu0 %v689_v0 }
  0x41   :  { %570 = vmatmul.mubr.bf16.vlgmr.msra.gmra.mxu1 %v53_v33 }
  0x42   :  { %573 = vmatprep.mubr.bf16.mxu1 %v54_v32 }
  0x46   :  { %276 = vmatmul.mubr.bf16.gmra.mxu0 %v53_v33 }
  0x47   :  { %285 = vmatprep.mubr.bf16.mxu0 %v689_v0 }
  0x49   :  { %574 = vmatmul.mubr.bf16.gmra.mxu1 %v55_v36 }
  0x4e   :  { %286 = vmatmul.mubr.bf16.gmra.mxu0 %v54_v32 }
  0x4f   :  { %295 = vmatprep.mubr.bf16.mxu0 %v689_v0 }
  0x56   :  { %296 = vmatmul.mubr.bf16.gmra.mxu0 %v55_v36 }
  0xfe   :  { %v267_v45 = vpop.f32.mrf.mxu0 }
  0xff   :  { %v268_v48 = vadd.f32 %v267_v45, %v727_v43 }
 0x100   :  { %v269_v47 = vpop.f32.mrf.mxu0 }
 0x101   :  { %v270_v49 = vadd.f32 %v269_v47, %v729_v44  ;;  %v571_v51 = vpop.f32.mrf.mxu1 }
 0x102   :  { %v271_v50 = vpop.f32.mrf.mxu0  ;;  %v349_v53 = vadd.f32 %v571_v51, %v101_v46 }
 0x103   :  { %v525_v52 = vpack.c.bf16 %v270_v49, %v268_v48  ;;  %v340_v55 = vpop.f32.mrf.mxu1  ;;  %v272_v56 = vadd.f32 %v271_v50, %v727_v43 }
 0x104   :  { %v273_v54 = vpop.f32.mrf.mxu0  ;;  %v530_v58 = vpack.c.bf16 %v349_v53, %v349_v53  ;;  %v341_v59 = vadd.f32 %v340_v55, %v101_v46 }
 0x105   :  { %451 = vst [vmem:[#allocation7] sm:$0xff] %v525_v52  ;;  %v274_v57 = vadd.f32 %v273_v54, %v729_v44  ;;  %v572_v61 = vpop.f32.mrf.mxu1 }
 0x106   :  { %v277_v60 = vpop.f32.mrf.mxu0  ;;  %456 = vst [vmem:[#allocation7 + $0x20] sm:$0xf] %v530_v58  ;;  %v526_v63 = vpack.c.bf16 %v341_v59, %v341_v59  ;;  %v352_v0 = vadd.f32 %v572_v61, %v101_v46 }
 0x107   :  { %v527_v62 = vpack.c.bf16 %v274_v57, %v272_v56  ;;  %v343_v2 = vpop.f32.mrf.mxu1  ;;  %v278_v3 = vadd.f32 %v277_v60, %v727_v43 }
 0x108   :  { %v279_v1 = vpop.f32.mrf.mxu0  ;;  %452 = vst [vmem:[#allocation7 + $0x8] sm:$0xf] %v526_v63  ;;  %v532_v5 = vpack.c.bf16 %v352_v0, %v352_v0  ;;  %v344_v6 = vadd.f32 %v343_v2, %v101_v46 }
 0x109   :  { %453 = vst [vmem:[#allocation7 + $0xc] sm:$0xff] %v527_v62  ;;  %v280_v4 = vadd.f32 %v279_v1, %v729_v44  ;;  %v575_v8 = vpop.f32.mrf.mxu1 }
 0x10a   :  { %v281_v7 = vpop.f32.mrf.mxu0  ;;  %458 = vst [vmem:[#allocation7 + $0x2c] sm:$0xf] %v532_v5  ;;  %v528_v10 = vpack.c.bf16 %v344_v6, %v344_v6  ;;  %v365_v11 = vadd.f32 %v575_v8, %v101_v46 }
 0x10b   :  { %v529_v9 = vpack.c.bf16 %v280_v4, %v278_v3  ;;  %v356_v13 = vpop.f32.mrf.mxu1  ;;  %v282_v14 = vadd.f32 %v281_v7, %v727_v43 }
 0x10c   :  { %v283_v12 = vpop.f32.mrf.mxu0  ;;  %454 = vst [vmem:[#allocation7 + $0x14] sm:$0xf] %v528_v10  ;;  %v538_v16 = vpack.c.bf16 %v365_v11, %v365_v11  ;;  %v357_v17 = vadd.f32 %v356_v13, %v101_v46 }
 0x10d   :  { %455 = vst [vmem:[#allocation7 + $0x18] sm:$0xff] %v529_v9  ;;  %v284_v15 = vadd.f32 %v283_v12, %v729_v44  ;;  %v576_v19 = vpop.f32.mrf.mxu1 }
 0x10e   :  { %v287_v18 = vpop.f32.mrf.mxu0  ;;  %464 = vst [vmem:[#allocation7 + $0x50] sm:$0xf] %v538_v16  ;;  %v534_v21 = vpack.c.bf16 %v357_v17, %v357_v17  ;;  %v368_v22 = vadd.f32 %v576_v19, %v101_v46 }
 0x10f   :  { %v531_v20 = vpack.c.bf16 %v284_v15, %v282_v14  ;;  %v359_v24 = vpop.f32.mrf.mxu1  ;;  %v288_v25 = vadd.f32 %v287_v18, %v727_v43 }
 0x110   :  { %v289_v23 = vpop.f32.mrf.mxu0  ;;  %460 = vst [vmem:[#allocation7 + $0x38] sm:$0xf] %v534_v21  ;;  %v540_v27 = vpack.c.bf16 %v368_v22, %v368_v22  ;;  %v360_v28 = vadd.f32 %v359_v24, %v101_v46 }
 0x111   :  { %457 = vst [vmem:[#allocation7 + $0x24] sm:$0xff] %v531_v20  ;;  %v290_v26 = vadd.f32 %v289_v23, %v729_v44 }
 0x112   :  { %v291_v29 = vpop.f32.mrf.mxu0  ;;  %466 = vst [vmem:[#allocation7 + $0x5c] sm:$0xf] %v540_v27  ;;  %v536_v31 = vpack.c.bf16 %v360_v28, %v360_v28 }
 0x113   :  { %v533_v30 = vpack.c.bf16 %v290_v26, %v288_v25  ;;  %v292_v33 = vadd.f32 %v291_v29, %v727_v43 }
 0x114   :  { %v293_v32 = vpop.f32.mrf.mxu0  ;;  %462 = vst [vmem:[#allocation7 + $0x44] sm:$0xf] %v536_v31 }
 0x115   :  { %459 = vst [vmem:[#allocation7 + $0x30] sm:$0xff] %v533_v30  ;;  %v294_v34 = vadd.f32 %v293_v32, %v729_v44 }
 0x116   :  { %v297_v35 = vpop.f32.mrf.mxu0 }
 0x117   :  { %v535_v36 = vpack.c.bf16 %v294_v34, %v292_v33  ;;  %v298_v38 = vadd.f32 %v297_v35, %v727_v43 }
 0x118   :  { %v299_v37 = vpop.f32.mrf.mxu0 }
 0x119   :  { %461 = vst [vmem:[#allocation7 + $0x3c] sm:$0xff] %v535_v36  ;;  %v300_v39 = vadd.f32 %v299_v37, %v729_v44 }
 0x11a   :  { %v301_v40 = vpop.f32.mrf.mxu0 }
 0x11b   :  { %v537_v41 = vpack.c.bf16 %v300_v39, %v298_v38  ;;  %v302_v45 = vadd.f32 %v301_v40, %v727_v43 }
 0x11c   :  { %v303_v42 = vpop.f32.mrf.mxu0 }
 0x11d   :  { %463 = vst [vmem:[#allocation7 + $0x48] sm:$0xff] %v537_v41  ;;  %v304_v46 = vadd.f32 %v303_v42, %v729_v44 }
 0x11f   :  { %v539_v47 = vpack.c.bf16 %v304_v46, %v302_v45 }
 0x121   :  { %465 = vst [vmem:[#allocation7 + $0x54] sm:$0xff] %v539_v47 }
 0x122   :  { %668 = shalt.err (!%p665_p0)
}
 0x123   :  { %478 = dma.vmem_to_hbm [thread:$0]  %s473_s26, 1536, %s756_s3, [#allocation4], %s687_s22, %s687_s22, %s688_s23  }
 0x124   :  { %681 = dma.done.wait [#allocation4], 1536  }
 0x125   :  { %682 = vsyncadd [#allocation4], 4294965760 }
 0x126   :  { %482 = vsyncpa [#allocation3], 1 }
 0x127   :  { %483 = vsyncpa [#allocation6], 1 }
 0x128   :  { %484 = vsyncpa [#allocation4], 1 }

</bundles_post_ra>
